<compile_context>
chip_gen: v7x
topology: tpu7x:2x2x1
jax: 0.10.0
libtpu: 0.0.40
codegen_flags: <defaults>
</compile_context>

<pallas_src>
import functools
import math

import jax
import jax.numpy as jnp
from jax.experimental import pallas as pl
from jax.experimental.pallas import tpu as pltpu


def _round_up(x, m):
    return ((x + m - 1) // m) * m


def _softplus(x):
    # numerically stable softplus with a single exp + log1p per element
    return jnp.maximum(x, 0.0) + jnp.log1p(jnp.exp(-jnp.abs(x)))


def vib_kernel(x_ref, w1_ref, b1_ref, w2_ref, b2_ref,
               wms_ref, bms_ref, wd_ref, bd_ref, eps_ref,
               out_ref, lat_ref, mu_ref, sig_ref, *, k_dim):
    cdt = x_ref.dtype                      # MXU compute dtype (bf16)
    x = x_ref[...]

    # fc1 + relu (f32 accumulation, cast back to bf16 for the next MXU pass)
    h1 = jnp.dot(x, w1_ref[...], preferred_element_type=jnp.float32) + b1_ref[...]
    h1 = jnp.maximum(h1, 0.0).astype(cdt)

    # fc2 + relu
    h2 = jnp.dot(h1, w2_ref[...], preferred_element_type=jnp.float32) + b2_ref[...]
    h2 = jnp.maximum(h2, 0.0).astype(cdt)

    # fused encoder_mean | encoder_std: one (H2, 2K) MXU pass, then split
    ms = jnp.dot(h2, wms_ref[...], preferred_element_type=jnp.float32) + bms_ref[...]
    mu = ms[:, :k_dim]
    sigma = _softplus(ms[:, k_dim:] - 5.0)

    # reparameterized Normal(mu, sigma) sample (eps generated outside the kernel)
    latent = mu + sigma * eps_ref[...]

    # decoder (lane-padded to 128) + softmax over the last dim.
    # Padded columns have zero weights and a -1e30 bias, so exp() == 0 there and
    # the softmax over the first `output_size` columns is exact.
    logits = (jnp.dot(latent.astype(cdt), wd_ref[...],
                      preferred_element_type=jnp.float32) + bd_ref[...])
    m = jnp.max(logits, axis=-1, keepdims=True)
    e = jnp.exp(logits - m)
    # exact f32 normalization (approx reciprocal is not accurate enough for the
    # sum-to-1 guarantee and the softmax here is far from the bottleneck)
    probs = e / jnp.sum(e, axis=-1, keepdims=True)

    out_ref[...] = probs
    lat_ref[...] = latent
    mu_ref[...] = mu
    sig_ref[...] = sigma


def vib_forward(x, params, eps, *, tile_b=256, compute_dtype=jnp.bfloat16):
    w1, b1, w2, b2, wm, bm, ws, bs, wd, bd = params
    B, IN = x.shape
    K = wm.shape[1]
    OUT = wd.shape[1]

    # ---------------- host-side layout plumbing (one-time cost) ----------------
    # fuse mean/std encoder weights into a single (H2, 2K) matmul
    wms = jnp.concatenate([wm, ws], axis=1)
    bms = jnp.concatenate([bm, bs], axis=1).astype(jnp.float32)

    # lane-dense decoder: pad output width up to a multiple of 128
    OUT_PAD = _round_up(OUT, 128)
    wd_p = jnp.zeros((K, OUT_PAD), wd.dtype).at[:, :OUT].set(wd)
    bd_p = jnp.full((1, OUT_PAD), -1e30, jnp.float32).at[:, :OUT].set(
        bd.astype(jnp.float32))

    # batch tiling: big MXU-friendly tiles; ceil-div grid + zero padding so the
    # tail rows are never dropped, regardless of B
    tile_b = max(8, min(tile_b, _round_up(B, 8)))
    B_pad = _round_up(B, tile_b)
    if B_pad != B:
        x = jnp.zeros((B_pad, IN), x.dtype).at[:B].set(x)
        eps = jnp.zeros((B_pad, K), eps.dtype).at[:B].set(eps)
    grid = (B_pad // tile_b,)

    # bf16 MXU operands (biases stay f32; accumulation stays f32 in-kernel)
    xc = x.astype(compute_dtype)
    w1c = w1.astype(compute_dtype)
    w2c = w2.astype(compute_dtype)
    wmsc = wms.astype(compute_dtype)
    wdc = wd_p.astype(compute_dtype)

    # grid-invariant weights/biases: whole-array, single-buffered VMEM residents
    resident = pl.BlockSpec(memory_space=pltpu.MemorySpace.VMEM)

    def per_batch(cols):
        return pl.BlockSpec((tile_b, cols), lambda i: (i, 0))

    out_shapes = (
        jax.ShapeDtypeStruct((B_pad, OUT_PAD), jnp.float32),  # softmax probs (padded)
        jax.ShapeDtypeStruct((B_pad, K), jnp.float32),        # latent
        jax.ShapeDtypeStruct((B_pad, K), jnp.float32),        # mu
        jax.ShapeDtypeStruct((B_pad, K), jnp.float32),        # sigma
    )

    out, lat, mu, sig = pl.pallas_call(
        functools.partial(vib_kernel, k_dim=K),
        out_shape=out_shapes,
        grid_spec=pltpu.PrefetchScalarGridSpec(
            num_scalar_prefetch=0,
            grid=grid,
            in_specs=[
                per_batch(IN),          # x tile
                resident, resident,     # fc1 W, b
                resident, resident,     # fc2 W, b
                resident, resident,     # fused encoder mean|std W, b
                resident, resident,     # decoder W, b (lane-padded)
                per_batch(K),           # eps tile
            ],
            out_specs=(
                per_batch(OUT_PAD),
                per_batch(K),
                per_batch(K),
                per_batch(K),
            ),
        ),
        compiler_params=pltpu.CompilerParams(
            dimension_semantics=("parallel",),
            vmem_limit_bytes=48 * 1024 * 1024,
        ),
    )(xc, w1c, b1.astype(jnp.float32), w2c, b2.astype(jnp.float32),
      wmsc, bms, wdc, bd_p, eps.astype(jnp.float32))

    return out[:B, :OUT], lat[:B], mu[:B], sig[:B]


def xavier_uniform(key, fan_in, fan_out):
    # matches nn.init.xavier_uniform_ (symmetric in fan_in/fan_out),
    # generated directly in (in, out) layout for the kernel
    limit = math.sqrt(6.0 / (fan_in + fan_out))
    return jax.random.uniform(key, (fan_in, fan_out), jnp.float32, -limit, limit)


if __name__ == "__main__":
    # small shapes consistent with the module (scaled down from 2048/1024/256/2)
    B, IN, H, K, OUT = 8, 256, 256, 128, 2

    key = jax.random.PRNGKey(0)
    kx, keps, k1, k2, km, ks, kd = jax.random.split(key, 7)

    x = jax.random.normal(kx, (B, IN), jnp.float32)
    # TODO(synk): Normal(mu, sigma).sample() is realized via externally drawn eps
    # (reparameterization); RNG is not generated inside the kernel.
    eps = jax.random.normal(keps, (B, K), jnp.float32)

    params = (
        xavier_uniform(k1, IN, H), jnp.zeros((1, H), jnp.float32),   # fc1
        xavier_uniform(k2, H, H), jnp.zeros((1, H), jnp.float32),    # fc2
        xavier_uniform(km, H, K), jnp.zeros((1, K), jnp.float32),    # encoder_mean
        xavier_uniform(ks, H, K), jnp.zeros((1, K), jnp.float32),    # encoder_std
        xavier_uniform(kd, K, OUT), jnp.zeros((1, OUT), jnp.float32),  # decoder
    )

    output, latent, mu, sigma = jax.block_until_ready(vib_forward(x, params, eps))

    # pure-JAX f32 reference of the same forward pass
    w1, b1, w2, b2, wm, bm, ws, bs, wd, bd = params
    h1 = jnp.maximum(x @ w1 + b1, 0.0)
    h2 = jnp.maximum(h1 @ w2 + b2, 0.0)
    mu_r = h2 @ wm + bm
    sig_r = jax.nn.softplus(h2 @ ws + bs - 5.0)
    lat_r = mu_r + sig_r * eps
    out_r = jax.nn.softmax(lat_r @ wd + bd, axis=1)

    assert output.shape == (B, OUT) and latent.shape == (B, K)
    assert mu.shape == (B, K) and sigma.shape == (B, K)
    # exact f32 normalization in the kernel -> row sums are 1 to f32 roundoff
    assert jnp.allclose(jnp.sum(output, axis=1), 1.0, atol=2e-3)
    assert bool(jnp.all(sigma > 0.0))
    # generous tolerances: bf16 matmul operands, f32 accumulation
    assert jnp.allclose(output, out_r, atol=5e-2)
    assert jnp.allclose(mu, mu_r, atol=1e-1)
    assert jnp.allclose(sigma, sig_r, atol=5e-2)
    assert jnp.allclose(latent, lat_r, atol=1e-1)

    print("KERNEL_OK")
</pallas_src>

<mosaic_0001>
module attributes {stable_mosaic.version = 11 : i64} {
  func.func @vib_kernel(%arg0: i32, %arg1: memref<8x256xbf16, #tpu.memory_space<vmem>>, %arg2: memref<256x256xbf16, #tpu.memory_space<vmem>>, %arg3: memref<1x256xf32, #tpu.memory_space<vmem>>, %arg4: memref<256x256xbf16, #tpu.memory_space<vmem>>, %arg5: memref<1x256xf32, #tpu.memory_space<vmem>>, %arg6: memref<256x256xbf16, #tpu.memory_space<vmem>>, %arg7: memref<1x256xf32, #tpu.memory_space<vmem>>, %arg8: memref<128x128xbf16, #tpu.memory_space<vmem>>, %arg9: memref<1x128xf32, #tpu.memory_space<vmem>>, %arg10: memref<8x128xf32, #tpu.memory_space<vmem>>, %arg11: memref<8x128xf32, #tpu.memory_space<vmem>>, %arg12: memref<8x128xf32, #tpu.memory_space<vmem>>, %arg13: memref<8x128xf32, #tpu.memory_space<vmem>>, %arg14: memref<8x128xf32, #tpu.memory_space<vmem>>) attributes {dimension_semantics = [#tpu.dimension_semantics<parallel>], iteration_bounds = array<i64: 1>, scalar_prefetch = 0 : i64, scratch_operands = 0 : i64, tpu.core_type = #tpu.core_type<tc>, window_params = [{transform_indices = @transform_0, window_bounds = array<i64: 8, 256>}, {pipeline_mode = #tpu.pipeline_mode<synchronous>, transform_indices = @transform_1, window_bounds = array<i64: 256, 256>}, {pipeline_mode = #tpu.pipeline_mode<synchronous>, transform_indices = @transform_2, window_bounds = array<i64: 1, 256>}, {pipeline_mode = #tpu.pipeline_mode<synchronous>, transform_indices = @transform_3, window_bounds = array<i64: 256, 256>}, {pipeline_mode = #tpu.pipeline_mode<synchronous>, transform_indices = @transform_4, window_bounds = array<i64: 1, 256>}, {pipeline_mode = #tpu.pipeline_mode<synchronous>, transform_indices = @transform_5, window_bounds = array<i64: 256, 256>}, {pipeline_mode = #tpu.pipeline_mode<synchronous>, transform_indices = @transform_6, window_bounds = array<i64: 1, 256>}, {pipeline_mode = #tpu.pipeline_mode<synchronous>, transform_indices = @transform_7, window_bounds = array<i64: 128, 128>}, {pipeline_mode = #tpu.pipeline_mode<synchronous>, transform_indices = @transform_8, window_bounds = array<i64: 1, 128>}, {transform_indices = @transform_9, window_bounds = array<i64: 8, 128>}, {transform_indices = @transform_10, window_bounds = array<i64: 8, 128>}, {transform_indices = @transform_11, window_bounds = array<i64: 8, 128>}, {transform_indices = @transform_12, window_bounds = array<i64: 8, 128>}, {transform_indices = @transform_13, window_bounds = array<i64: 8, 128>}]} {
    %c0 = arith.constant 0 : index
    %c0_0 = arith.constant 0 : index
    %0 = vector.load %arg1[%c0, %c0_0] : memref<8x256xbf16, #tpu.memory_space<vmem>>, vector<8x256xbf16>
    %c0_1 = arith.constant 0 : index
    %c0_2 = arith.constant 0 : index
    %1 = vector.load %arg2[%c0_1, %c0_2] : memref<256x256xbf16, #tpu.memory_space<vmem>>, vector<256x256xbf16>
    %cst = arith.constant dense<0.000000e+00> : vector<8x256xf32>
    %2 = tpu.matmul %0, %1, %cst {dimension_numbers = #tpu.dot_dimension_numbers<[1], [0], [0], [1], [0, 0, 1, 1], [], []>} : vector<8x256xbf16>, vector<256x256xbf16>, vector<8x256xf32> -> vector<8x256xf32>
    %c0_3 = arith.constant 0 : index
    %c0_4 = arith.constant 0 : index
    %3 = vector.load %arg3[%c0_3, %c0_4] : memref<1x256xf32, #tpu.memory_space<vmem>>, vector<1x256xf32>
    %4 = vector.broadcast %3 : vector<1x256xf32> to vector<8x256xf32>
    %5 = arith.addf %2, %4 : vector<8x256xf32>
    %cst_5 = arith.constant 0.000000e+00 : f32
    %6 = vector.broadcast %cst_5 : f32 to vector<8x256xf32>
    %7 = arith.maximumf %5, %6 : vector<8x256xf32>
    %8 = arith.truncf %7 : vector<8x256xf32> to vector<8x256xbf16>
    %c0_6 = arith.constant 0 : index
    %c0_7 = arith.constant 0 : index
    %9 = vector.load %arg4[%c0_6, %c0_7] : memref<256x256xbf16, #tpu.memory_space<vmem>>, vector<256x256xbf16>
    %cst_8 = arith.constant dense<0.000000e+00> : vector<8x256xf32>
    %10 = tpu.matmul %8, %9, %cst_8 {dimension_numbers = #tpu.dot_dimension_numbers<[1], [0], [0], [1], [0, 0, 1, 1], [], []>} : vector<8x256xbf16>, vector<256x256xbf16>, vector<8x256xf32> -> vector<8x256xf32>
    %c0_9 = arith.constant 0 : index
    %c0_10 = arith.constant 0 : index
    %11 = vector.load %arg5[%c0_9, %c0_10] : memref<1x256xf32, #tpu.memory_space<vmem>>, vector<1x256xf32>
    %12 = vector.broadcast %11 : vector<1x256xf32> to vector<8x256xf32>
    %13 = arith.addf %10, %12 : vector<8x256xf32>
    %cst_11 = arith.constant 0.000000e+00 : f32
    %14 = vector.broadcast %cst_11 : f32 to vector<8x256xf32>
    %15 = arith.maximumf %13, %14 : vector<8x256xf32>
    %16 = arith.truncf %15 : vector<8x256xf32> to vector<8x256xbf16>
    %c0_12 = arith.constant 0 : index
    %c0_13 = arith.constant 0 : index
    %17 = vector.load %arg6[%c0_12, %c0_13] : memref<256x256xbf16, #tpu.memory_space<vmem>>, vector<256x256xbf16>
    %cst_14 = arith.constant dense<0.000000e+00> : vector<8x256xf32>
    %18 = tpu.matmul %16, %17, %cst_14 {dimension_numbers = #tpu.dot_dimension_numbers<[1], [0], [0], [1], [0, 0, 1, 1], [], []>} : vector<8x256xbf16>, vector<256x256xbf16>, vector<8x256xf32> -> vector<8x256xf32>
    %c0_15 = arith.constant 0 : index
    %c0_16 = arith.constant 0 : index
    %19 = vector.load %arg7[%c0_15, %c0_16] : memref<1x256xf32, #tpu.memory_space<vmem>>, vector<1x256xf32>
    %20 = vector.broadcast %19 : vector<1x256xf32> to vector<8x256xf32>
    %21 = arith.addf %18, %20 : vector<8x256xf32>
    %22 = vector.extract_strided_slice %21 {offsets = [0, 0], sizes = [8, 128], strides = [1, 1]} : vector<8x256xf32> to vector<8x128xf32>
    %23 = vector.extract_strided_slice %21 {offsets = [0, 128], sizes = [8, 128], strides = [1, 1]} : vector<8x256xf32> to vector<8x128xf32>
    %cst_17 = arith.constant 5.000000e+00 : f32
    %24 = vector.broadcast %cst_17 : f32 to vector<8x128xf32>
    %25 = arith.subf %23, %24 : vector<8x128xf32>
    %cst_18 = arith.constant 0.000000e+00 : f32
    %26 = vector.broadcast %cst_18 : f32 to vector<8x128xf32>
    %27 = arith.maximumf %25, %26 : vector<8x128xf32>
    %28 = math.absf %25 : vector<8x128xf32>
    %cst_19 = arith.constant 0.000000e+00 : f32
    %29 = vector.broadcast %cst_19 : f32 to vector<8x128xf32>
    %30 = arith.subf %29, %28 : vector<8x128xf32>
    %31 = math.exp %30 : vector<8x128xf32>
    %32 = math.log1p %31 : vector<8x128xf32>
    %33 = arith.addf %27, %32 : vector<8x128xf32>
    %c0_20 = arith.constant 0 : index
    %c0_21 = arith.constant 0 : index
    %34 = vector.load %arg10[%c0_20, %c0_21] : memref<8x128xf32, #tpu.memory_space<vmem>>, vector<8x128xf32>
    %35 = arith.mulf %33, %34 : vector<8x128xf32>
    %36 = arith.addf %22, %35 : vector<8x128xf32>
    %37 = arith.truncf %36 : vector<8x128xf32> to vector<8x128xbf16>
    %c0_22 = arith.constant 0 : index
    %c0_23 = arith.constant 0 : index
    %38 = vector.load %arg8[%c0_22, %c0_23] : memref<128x128xbf16, #tpu.memory_space<vmem>>, vector<128x128xbf16>
    %cst_24 = arith.constant dense<0.000000e+00> : vector<8x128xf32>
    %39 = tpu.matmul %37, %38, %cst_24 {dimension_numbers = #tpu.dot_dimension_numbers<[1], [0], [0], [1], [0, 0, 1, 1], [], []>} : vector<8x128xbf16>, vector<128x128xbf16>, vector<8x128xf32> -> vector<8x128xf32>
    %c0_25 = arith.constant 0 : index
    %c0_26 = arith.constant 0 : index
    %40 = vector.load %arg9[%c0_25, %c0_26] : memref<1x128xf32, #tpu.memory_space<vmem>>, vector<1x128xf32>
    %41 = vector.broadcast %40 : vector<1x128xf32> to vector<8x128xf32>
    %42 = arith.addf %39, %41 : vector<8x128xf32>
    %cst_27 = arith.constant dense<0xFF800000> : vector<8xf32>
    %43 = vector.multi_reduction <maximumf>, %42, %cst_27 [1] : vector<8x128xf32> to vector<8xf32>
    %44 = vector.shape_cast %43 : vector<8xf32> to vector<8x1xf32>
    %45 = vector.broadcast %44 : vector<8x1xf32> to vector<8x128xf32>
    %46 = arith.subf %42, %45 : vector<8x128xf32>
    %47 = math.exp %46 : vector<8x128xf32>
    %cst_28 = arith.constant dense<0.000000e+00> : vector<8xf32>
    %48 = vector.multi_reduction <add>, %47, %cst_28 [1] : vector<8x128xf32> to vector<8xf32>
    %49 = vector.shape_cast %48 : vector<8xf32> to vector<8x1xf32>
    %50 = vector.broadcast %49 : vector<8x1xf32> to vector<8x128xf32>
    %51 = arith.divf %47, %50 : vector<8x128xf32>
    %c0_29 = arith.constant 0 : index
    %c0_30 = arith.constant 0 : index
    %52 = vector.load %arg11[%c0_29, %c0_30] : memref<8x128xf32, #tpu.memory_space<vmem>>, vector<8x128xf32>
    tpu.vector_store %arg11[%c0_29, %c0_30], %51 {strides = array<i32>} : memref<8x128xf32, #tpu.memory_space<vmem>>, vector<8x128xf32>,
    %c0_31 = arith.constant 0 : index
    %c0_32 = arith.constant 0 : index
    %53 = vector.load %arg12[%c0_31, %c0_32] : memref<8x128xf32, #tpu.memory_space<vmem>>, vector<8x128xf32>
    tpu.vector_store %arg12[%c0_31, %c0_32], %36 {strides = array<i32>} : memref<8x128xf32, #tpu.memory_space<vmem>>, vector<8x128xf32>,
    %c0_33 = arith.constant 0 : index
    %c0_34 = arith.constant 0 : index
    %54 = vector.load %arg13[%c0_33, %c0_34] : memref<8x128xf32, #tpu.memory_space<vmem>>, vector<8x128xf32>
    tpu.vector_store %arg13[%c0_33, %c0_34], %22 {strides = array<i32>} : memref<8x128xf32, #tpu.memory_space<vmem>>, vector<8x128xf32>,
    %c0_35 = arith.constant 0 : index
    %c0_36 = arith.constant 0 : index
    %55 = vector.load %arg14[%c0_35, %c0_36] : memref<8x128xf32, #tpu.memory_space<vmem>>, vector<8x128xf32>
    tpu.vector_store %arg14[%c0_35, %c0_36], %33 {strides = array<i32>} : memref<8x128xf32, #tpu.memory_space<vmem>>, vector<8x128xf32>,
    return
  }
  func.func @transform_0(%arg0: i32) -> (i32, i32) {
    %c0_i32 = arith.constant 0 : i32
    %c0_i32_0 = arith.constant 0 : i32
    return %arg0, %c0_i32 : i32, i32
  }
  func.func @transform_1(%arg0: i32) -> (i32, i32) {
    %c0_i32 = arith.constant 0 : i32
    %c0_i32_0 = arith.constant 0 : i32
    %c0_i32_1 = arith.constant 0 : i32
    return %c0_i32, %c0_i32_0 : i32, i32
  }
  func.func @transform_2(%arg0: i32) -> (i32, i32) {
    %c0_i32 = arith.constant 0 : i32
    %c0_i32_0 = arith.constant 0 : i32
    %c0_i32_1 = arith.constant 0 : i32
    return %c0_i32, %c0_i32_0 : i32, i32
  }
  func.func @transform_3(%arg0: i32) -> (i32, i32) {
    %c0_i32 = arith.constant 0 : i32
    %c0_i32_0 = arith.constant 0 : i32
    %c0_i32_1 = arith.constant 0 : i32
    return %c0_i32, %c0_i32_0 : i32, i32
  }
  func.func @transform_4(%arg0: i32) -> (i32, i32) {
    %c0_i32 = arith.constant 0 : i32
    %c0_i32_0 = arith.constant 0 : i32
    %c0_i32_1 = arith.constant 0 : i32
    return %c0_i32, %c0_i32_0 : i32, i32
  }
  func.func @transform_5(%arg0: i32) -> (i32, i32) {
    %c0_i32 = arith.constant 0 : i32
    %c0_i32_0 = arith.constant 0 : i32
    %c0_i32_1 = arith.constant 0 : i32
    return %c0_i32, %c0_i32_0 : i32, i32
  }
  func.func @transform_6(%arg0: i32) -> (i32, i32) {
    %c0_i32 = arith.constant 0 : i32
    %c0_i32_0 = arith.constant 0 : i32
    %c0_i32_1 = arith.constant 0 : i32
    return %c0_i32, %c0_i32_0 : i32, i32
  }
  func.func @transform_7(%arg0: i32) -> (i32, i32) {
    %c0_i32 = arith.constant 0 : i32
    %c0_i32_0 = arith.constant 0 : i32
    %c0_i32_1 = arith.constant 0 : i32
    return %c0_i32, %c0_i32_0 : i32, i32
  }
  func.func @transform_8(%arg0: i32) -> (i32, i32) {
    %c0_i32 = arith.constant 0 : i32
    %c0_i32_0 = arith.constant 0 : i32
    %c0_i32_1 = arith.constant 0 : i32
    return %c0_i32, %c0_i32_0 : i32, i32
  }
  func.func @transform_9(%arg0: i32) -> (i32, i32) {
    %c0_i32 = arith.constant 0 : i32
    %c0_i32_0 = arith.constant 0 : i32
    return %arg0, %c0_i32 : i32, i32
  }
  func.func @transform_10(%arg0: i32) -> (i32, i32) {
    %c0_i32 = arith.constant 0 : i32
    %c0_i32_0 = arith.constant 0 : i32
    return %arg0, %c0_i32 : i32, i32
  }
  func.func @transform_11(%arg0: i32) -> (i32, i32) {
    %c0_i32 = arith.constant 0 : i32
    %c0_i32_0 = arith.constant 0 : i32
    return %arg0, %c0_i32 : i32, i32
  }
  func.func @transform_12(%arg0: i32) -> (i32, i32) {
    %c0_i32 = arith.constant 0 : i32
    %c0_i32_0 = arith.constant 0 : i32
    return %arg0, %c0_i32 : i32, i32
  }
  func.func @transform_13(%arg0: i32) -> (i32, i32) {
    %c0_i32 = arith.constant 0 : i32
    %c0_i32_0 = arith.constant 0 : i32
    return %arg0, %c0_i32 : i32, i32
  }
}

</mosaic_0001>

<bundles_post_ra>
// kernel: tpu_custom_call.1
= control target key start
LH: loop header
LB: loop body
LE: loop exit
PB: predicated region body
PF: predicated region fallthrough
CT: control target
= control target key end

     0   :  { %19 = vsyncpa [#allocation3], 0  ;;  %s1819_s0 = inlined_call_operand.hbm [shape: bf16[8,256], index: 0, kind: input, shape index: {}]   ;;  %s1820_s1 = inlined_call_operand.hbm [shape: bf16[256,256], index: 1, kind: input, shape index: {}]   ;;  %s1821_s2 = inlined_call_operand.vmem [shape: f32[1,256], index: 2, kind: input, shape index: {}]   ;;  %s1822_s3 = inlined_call_operand.hbm [shape: bf16[256,256], index: 3, kind: input, shape index: {}]   ;;  %s1823_s4 = inlined_call_operand.vmem [shape: f32[1,256], index: 4, kind: input, shape index: {}]   ;;  %s1824_s5 = inlined_call_operand.hbm [shape: bf16[256,256], index: 5, kind: input, shape index: {}]   ;;  %s1825_s6 = inlined_call_operand.vmem [shape: f32[1,256], index: 6, kind: input, shape index: {}]   ;;  %s1826_s7 = inlined_call_operand.hbm [shape: bf16[128,128], index: 7, kind: input, shape index: {}]   ;;  %s1827_s8 = inlined_call_operand.vmem [shape: f32[1,128], index: 8, kind: input, shape index: {}]   ;;  %s1828_s9 = inlined_call_operand.vmem [shape: f32[8,128], index: 9, kind: input, shape index: {}]   ;;  %s1829_s10 = inlined_call_operand.hbm [shape: f32[8,128], index: 10, kind: output, shape index: {0}]   ;;  %s1830_s11 = inlined_call_operand.hbm [shape: f32[8,128], index: 11, kind: output, shape index: {1}]   ;;  %s1831_s12 = inlined_call_operand.hbm [shape: f32[8,128], index: 12, kind: output, shape index: {2}]   ;;  %s1832_s13 = inlined_call_operand.hbm [shape: f32[8,128], index: 13, kind: output, shape index: {3}]  }
   0x1   :  { %20 = vsyncpa [#allocation6], 0 }
   0x2   :  { %21 = vsyncpa [#allocation9], 0 }
   0x3   :  { %22 = vsyncpa [#allocation4], 0 }
   0x4   :  { %23 = vsyncpa [#allocation13], 0 }
   0x5   :  { %24 = vsyncpa [#allocation16], 0  ;;  %s1586_s25 = smov [#allocation5]   ;;  %s1376_s29 = scalar_lea.hbm %s1820_s1, 4096 }
   0x6   :  { %s40_s26 = sshll.u32 %s1586_s25, 4  ;;  %p1377_p0 = scmp.ne.s32.totalorder %s1820_s1, %s1376_s29  ;;  %s41_s26 = int_to_ptr.vmem [resolvable:$true] %s40_s26 }
   0x7   :  { %p1380_p1 = scmp.lt.u32.totalorder %s1376_s29, %s1820_s1 }
   0x9   :  { %p1382_p2 = pnand %p1380_p1, %p1377_p0 }
   0xb   :  { %1385 = shalt.err (!%p1382_p2)
}
   0xc   :  { %s1386_s17 = scalar_lea.vmem %s41_s26, 4096  ;;  %p1391_p4 = scmp.lt.s32.totalorder %s41_s26, %s41_s26 }
   0xd   :  { %p1387_p3 = scmp.ne.s32.totalorder %s41_s26, %s1386_s17  ;;  %p1392_p5 = scmp.lt.s32.totalorder %s1386_s17, %s1386_s17 }
   0xf   :  { %p1393_p6 = por %p1392_p5, %p1391_p4 }
  0x11   :  { %p1394_p7 = pnand %p1393_p6, %p1387_p3 }
  0x13   :  { %1397 = shalt.err (!%p1394_p7)
}
  0x14   :  { %s1587_s18 = smov 128   ;;  %s1588_s19 = smov 8  }
  0x15   :  { %46 = dma.hbm_to_vmem [thread:$0]  %s1820_s1, 4096, %s41_s26, [#allocation6], %s1587_s18, %s1587_s18, %s1588_s19  }
  0x16   :  { %s1589_s22 = smov [#allocation8]   ;;  %s1590_s24 = smov [#allocation2]  }
  0x17   :  { %s68_s23 = sshll.u32 %s1589_s22, 4  ;;  %s31_s25 = sshll.u32 %s1590_s24, 4  ;;  %s69_s23 = int_to_ptr.vmem [resolvable:$true] %s68_s23  ;;  %s32_s25 = int_to_ptr.vmem [resolvable:$true] %s31_s25 }
  0x18   :  { %s1398_s29 = scalar_lea.hbm %s1824_s5, 4096 }
  0x19   :  { %p1399_p8 = scmp.ne.s32.totalorder %s1824_s5, %s1398_s29  ;;  %p1402_p9 = scmp.lt.u32.totalorder %s1398_s29, %s1824_s5 }
  0x1b   :  { %p1404_p10 = pnand %p1402_p9, %p1399_p8 }
  0x1d   :  { %1407 = shalt.err (!%p1404_p10)
}
  0x1e   :  { %s1408_s1 = scalar_lea.vmem %s69_s23, 4096  ;;  %p1413_p12 = scmp.lt.s32.totalorder %s69_s23, %s69_s23 }
  0x1f   :  { %p1409_p11 = scmp.ne.s32.totalorder %s69_s23, %s1408_s1  ;;  %p1414_p13 = scmp.lt.s32.totalorder %s1408_s1, %s1408_s1 }
  0x21   :  { %p1415_p0 = por %p1414_p13, %p1413_p12 }
  0x23   :  { %p1416_p1 = pnand %p1415_p0, %p1409_p11 }
  0x25   :  { %1419 = shalt.err (!%p1416_p1)
}
  0x26   :  { %74 = dma.hbm_to_vmem [thread:$0]  %s1824_s5, 4096, %s69_s23, [#allocation9], %s1587_s18, %s1587_s18, %s1588_s19  }
  0x27   :  { %s1420_s22 = scalar_lea.hbm %s1819_s0, 128 }
  0x28   :  { %p1421_p2 = scmp.ne.s32.totalorder %s1819_s0, %s1420_s22  ;;  %p1424_p3 = scmp.lt.u32.totalorder %s1420_s22, %s1819_s0 }
  0x2a   :  { %p1426_p4 = pnand %p1424_p3, %p1421_p2 }
  0x2c   :  { %1429 = shalt.err (!%p1426_p4)
}
  0x2d   :  { %s1430_s30 = scalar_lea.vmem %s32_s25, 128  ;;  %p1435_p6 = scmp.lt.s32.totalorder %s32_s25, %s32_s25 }
  0x2e   :  { %p1431_p5 = scmp.ne.s32.totalorder %s32_s25, %s1430_s30  ;;  %p1436_p7 = scmp.lt.s32.totalorder %s1430_s30, %s1430_s30 }
  0x30   :  { %p1437_p8 = por %p1436_p7, %p1435_p6 }
  0x32   :  { %p1438_p9 = pnand %p1437_p8, %p1431_p5 }
  0x34   :  { %1441 = shalt.err (!%p1438_p9)
}
  0x35   :  { %34 = dma.hbm_to_vmem [thread:$0]  %s1819_s0, 128, %s32_s25, [#allocation3]  }
  0x36   :  { %s1591_s14 = smov [#allocation7]   ;;  %s1592_s16 = smov [#allocation10]  }
  0x37   :  { %s54_s15 = sshll.u32 %s1591_s14, 4  ;;  %s82_s1 = sshll.u32 %s1592_s16, 4  ;;  %s55_s15 = int_to_ptr.vmem [resolvable:$true] %s54_s15  ;;  %s83_s1 = int_to_ptr.vmem [resolvable:$true] %s82_s1 }
  0x38   :  { %s1442_s20 = scalar_lea.hbm %s1822_s3, 4096 }
  0x39   :  { %p1443_p10 = scmp.ne.s32.totalorder %s1822_s3, %s1442_s20  ;;  %p1446_p11 = scmp.lt.u32.totalorder %s1442_s20, %s1822_s3 }
  0x3b   :  { %p1448_p12 = pnand %p1446_p11, %p1443_p10 }
  0x3d   :  { %1451 = shalt.err (!%p1448_p12)
}
  0x3e   :  { %s1452_s0 = scalar_lea.vmem %s55_s15, 4096  ;;  %p1457_p0 = scmp.lt.s32.totalorder %s55_s15, %s55_s15 }
  0x3f   :  { %p1453_p13 = scmp.ne.s32.totalorder %s55_s15, %s1452_s0  ;;  %p1458_p1 = scmp.lt.s32.totalorder %s1452_s0, %s1452_s0 }
  0x41   :  { %p1459_p2 = por %p1458_p1, %p1457_p0 }
  0x43   :  { %p1460_p3 = pnand %p1459_p2, %p1453_p13 }
  0x45   :  { %1463 = shalt.err (!%p1460_p3)
}
  0x46   :  { %60 = dma.hbm_to_vmem [thread:$0]  %s1822_s3, 4096, %s55_s15, [#allocation6], %s1587_s18, %s1587_s18, %s1588_s19  }
  0x47   :  { %s1464_s5 = scalar_lea.hbm %s1826_s7, 1024 }
  0x48   :  { %p1465_p4 = scmp.ne.s32.totalorder %s1826_s7, %s1464_s5  ;;  %p1468_p5 = scmp.lt.u32.totalorder %s1464_s5, %s1826_s7 }
  0x4a   :  { %p1470_p6 = pnand %p1468_p5, %p1465_p4 }
  0x4c   :  { %1473 = shalt.err (!%p1470_p6)
}
  0x4d   :  { %s1474_s17 = scalar_lea.vmem %s83_s1, 1024  ;;  %p1479_p8 = scmp.lt.s32.totalorder %s83_s1, %s83_s1 }
  0x4e   :  { %p1475_p7 = scmp.ne.s32.totalorder %s83_s1, %s1474_s17  ;;  %p1480_p9 = scmp.lt.s32.totalorder %s1474_s17, %s1474_s17 }
  0x50   :  { %p1481_p10 = por %p1480_p9, %p1479_p8 }
  0x52   :  { %p1482_p11 = pnand %p1481_p10, %p1475_p7 }
  0x54   :  { %1485 = shalt.err (!%p1482_p11)
}
  0x55   :  { %s1593_s3 = smov 64   ;;  %s1594_s18 = smov 4  }
  0x56   :  { %88 = dma.hbm_to_vmem [thread:$0]  %s1826_s7, 1024, %s83_s1, [#allocation9], %s1593_s3, %s1593_s3, %s1594_s18  }
  0x57   :  { %1574 = dma.done.wait [#allocation3], 128  }
  0x58   :  { %1575 = vsyncadd [#allocation3], 4294967168 }
  0x59   :  { %1576 = dma.done.wait [#allocation6], 8192  }
  0x5a   :  { %1577 = vsyncadd [#allocation6], 4294959104 }
  0x5b   :  { %1578 = dma.done.wait [#allocation9], 5120  }
  0x5c   :  { %1579 = vsyncadd [#allocation9], 4294962176  ;;  %v1214_v0 = vld [vmem:[#allocation5 + $0x4] ss:$8 sps:$4 sm:$0xff]   ;;  %v1216_v1 = vld [vmem:[#allocation5] ss:$8 sps:$4 sm:$0xff]  }
  0x5d   :  { %321 = vmatprep.subr.bf16.mxu0 %v1214_v0  ;;  %v1217_v2 = vld [vmem:[#allocation5 + $0x14] ss:$8 sps:$4 sm:$0xff]   ;;  %v1219_v3 = vld [vmem:[#allocation5 + $0x10] ss:$8 sps:$4 sm:$0xff]   ;;  %v1220_v4 = vld [vmem:[#allocation5 + $0x24] ss:$8 sps:$4 sm:$0xff]  }
  0x5e   :  { %322 = vmatpush1.bf16.msra.mxu0 %v1216_v1  ;;  %v1222_v5 = vld [vmem:[#allocation5 + $0x20] ss:$8 sps:$4 sm:$0xff]   ;;  %v1223_v6 = vld [vmem:[#allocation5 + $0x34] ss:$8 sps:$4 sm:$0xff]   ;;  %v1225_v7 = vld [vmem:[#allocation5 + $0x30] ss:$8 sps:$4 sm:$0xff]  }
  0x5f   :  { %323 = vmatprep.subr.bf16.mxu0 %v1217_v2  ;;  %v1226_v8 = vld [vmem:[#allocation5 + $0x44] ss:$8 sps:$4 sm:$0xff]   ;;  %v1228_v9 = vld [vmem:[#allocation5 + $0x40] ss:$8 sps:$4 sm:$0xff]   ;;  %v1229_v10 = vld [vmem:[#allocation5 + $0x54] ss:$8 sps:$4 sm:$0xff]  }
  0x60   :  { %v1231_v11 = vld [vmem:[#allocation5 + $0x50] ss:$8 sps:$4 sm:$0xff]   ;;  %v1232_v12 = vld [vmem:[#allocation5 + $0x64] ss:$8 sps:$4 sm:$0xff]   ;;  %v1234_v13 = vld [vmem:[#allocation5 + $0x60] ss:$8 sps:$4 sm:$0xff]  }
  0x61   :  { %v1740_v14 = vld [vmem:[#allocation2] sm:$0xff]  ;;  %v1264_v16 = vld [vmem:[#allocation7 + $0x4] ss:$8 sps:$4 sm:$0xff]   ;;  %v1266_v17 = vld [vmem:[#allocation7] ss:$8 sps:$4 sm:$0xff]   ;;  %vm1596_vm0 = vmmov 0  }
  0x62   :  { %324 = vmatpush1.bf16.msra.mxu0 %v1219_v3  ;;  %v1063_v15 = vcombine.high %v1740_v14, %v1740_v14  ;;  %v1267_v18 = vld [vmem:[#allocation7 + $0x14] ss:$8 sps:$4 sm:$0xff]   ;;  %570 = vmatprep.subr.bf16.mxu1 %v1264_v16  ;;  %v1237_v20 = vld [vmem:[#allocation5 + $0x70] ss:$8 sps:$4 sm:$0xff]   ;;  %v1270_v22 = vld [vmem:[#allocation7 + $0x24] ss:$8 sps:$4 sm:$0xff]   ;;  %v1062_v55 = vcombine.low %v1740_v14, %v1740_v14 }
  0x63   :  { %325 = vmatprep.subr.bf16.mxu0 %v1220_v4  ;;  %v1235_v19 = vld [vmem:[#allocation5 + $0x74] ss:$8 sps:$4 sm:$0xff]   ;;  %571 = vmatpush1.bf16.msra.mxu1 %v1266_v17  ;;  %v1269_v21 = vld [vmem:[#allocation7 + $0x10] ss:$8 sps:$4 sm:$0xff]   ;;  %v1238_v23 = vld [vmem:[#allocation5 + $0x84] ss:$8 sps:$4 sm:$0xff]  }
  0x64   :  { %353 = vmatprep.mubr.bf16.mxu0 %v1063_v15  ;;  %572 = vmatprep.subr.bf16.mxu1 %v1267_v18  ;;  %v1240_v24 = vld [vmem:[#allocation5 + $0x80] ss:$8 sps:$4 sm:$0xff]   ;;  %v1273_v26 = vld [vmem:[#allocation7 + $0x34] ss:$8 sps:$4 sm:$0xff]   ;;  %v1243_v28 = vld [vmem:[#allocation5 + $0x90] ss:$8 sps:$4 sm:$0xff]  }
  0x65   :  { %v1272_v25 = vld [vmem:[#allocation7 + $0x20] ss:$8 sps:$4 sm:$0xff]   ;;  %v1241_v27 = vld [vmem:[#allocation5 + $0x94] ss:$8 sps:$4 sm:$0xff]   ;;  %v1275_v29 = vld [vmem:[#allocation7 + $0x30] ss:$8 sps:$4 sm:$0xff]  }
  0x66   :  { %326 = vmatpush1.bf16.msra.mxu0 %v1222_v5  ;;  %v1276_v30 = vld [vmem:[#allocation7 + $0x44] ss:$8 sps:$4 sm:$0xff]   ;;  %v1246_v32 = vld [vmem:[#allocation5 + $0xa0] ss:$8 sps:$4 sm:$0xff]   ;;  %v1279_v34 = vld [vmem:[#allocation7 + $0x54] ss:$8 sps:$4 sm:$0xff]  }
  0x67   :  { %327 = vmatprep.subr.bf16.mxu0 %v1223_v6  ;;  %573 = vmatpush1.bf16.msra.mxu1 %v1269_v21  ;;  %v1244_v31 = vld [vmem:[#allocation5 + $0xa4] ss:$8 sps:$4 sm:$0xff]   ;;  %v1278_v33 = vld [vmem:[#allocation7 + $0x40] ss:$8 sps:$4 sm:$0xff]   ;;  %v1247_v35 = vld [vmem:[#allocation5 + $0xb4] ss:$8 sps:$4 sm:$0xff]  }
  0x68   :  { %574 = vmatprep.subr.bf16.mxu1 %v1270_v22  ;;  %v1281_v36 = vld [vmem:[#allocation7 + $0x50] ss:$8 sps:$4 sm:$0xff]   ;;  %v1282_v38 = vld [vmem:[#allocation7 + $0x64] ss:$8 sps:$4 sm:$0xff]   ;;  %v1284_v40 = vld [vmem:[#allocation7 + $0x60] ss:$8 sps:$4 sm:$0xff]  }
  0x69   :  { %v1249_v37 = vld [vmem:[#allocation5 + $0xb0] ss:$8 sps:$4 sm:$0xff]   ;;  %v1250_v39 = vld [vmem:[#allocation5 + $0xc4] ss:$8 sps:$4 sm:$0xff]   ;;  %v1252_v41 = vld [vmem:[#allocation5 + $0xc0] ss:$8 sps:$4 sm:$0xff]  }
  0x6a   :  { %328 = vmatpush1.bf16.msra.mxu0 %v1225_v7  ;;  %v1285_v42 = vld [vmem:[#allocation7 + $0x74] ss:$8 sps:$4 sm:$0xff]   ;;  %v1287_v44 = vld [vmem:[#allocation7 + $0x70] ss:$8 sps:$4 sm:$0xff]   ;;  %v1288_v46 = vld [vmem:[#allocation7 + $0x84] ss:$8 sps:$4 sm:$0xff]  }
  0x6b   :  { %329 = vmatprep.subr.bf16.mxu0 %v1226_v8  ;;  %575 = vmatpush1.bf16.msra.mxu1 %v1272_v25  ;;  %v1253_v43 = vld [vmem:[#allocation5 + $0xd4] ss:$8 sps:$4 sm:$0xff]   ;;  %v1255_v45 = vld [vmem:[#allocation5 + $0xd0] ss:$8 sps:$4 sm:$0xff]   ;;  %v1256_v47 = vld [vmem:[#allocation5 + $0xe4] ss:$8 sps:$4 sm:$0xff]  }
  0x6c   :  { %576 = vmatprep.subr.bf16.mxu1 %v1273_v26  ;;  %v1290_v48 = vld [vmem:[#allocation7 + $0x80] ss:$8 sps:$4 sm:$0xff]   ;;  %v1291_v50 = vld [vmem:[#allocation7 + $0x94] ss:$8 sps:$4 sm:$0xff]   ;;  %v1293_v52 = vld [vmem:[#allocation7 + $0x90] ss:$8 sps:$4 sm:$0xff]  }
  0x6d   :  { %v1258_v49 = vld [vmem:[#allocation5 + $0xe0] ss:$8 sps:$4 sm:$0xff]   ;;  %v1259_v51 = vld [vmem:[#allocation5 + $0xf4] ss:$8 sps:$4 sm:$0xff]   ;;  %v1261_v53 = vld [vmem:[#allocation5 + $0xf0] ss:$8 sps:$4 sm:$0xff]  }
  0x6e   :  { %330 = vmatpush1.bf16.msra.mxu0 %v1228_v9  ;;  %v1294_v54 = vld [vmem:[#allocation7 + $0xa4] ss:$8 sps:$4 sm:$0xff]   ;;  %v1296_v56 = vld [vmem:[#allocation7 + $0xa0] ss:$8 sps:$4 sm:$0xff]   ;;  %v1297_v57 = vld [vmem:[#allocation7 + $0xb4] ss:$8 sps:$4 sm:$0xff]  }
  0x6f   :  { %331 = vmatprep.subr.bf16.mxu0 %v1229_v10  ;;  %577 = vmatpush1.bf16.msra.mxu1 %v1275_v29  ;;  %v1299_v58 = vld [vmem:[#allocation7 + $0xb0] ss:$8 sps:$4 sm:$0xff]   ;;  %v1300_v59 = vld [vmem:[#allocation7 + $0xc4] ss:$8 sps:$4 sm:$0xff]   ;;  %v1302_v60 = vld [vmem:[#allocation7 + $0xc0] ss:$8 sps:$4 sm:$0xff]  }
  0x70   :  { %578 = vmatprep.subr.bf16.mxu1 %v1276_v30  ;;  %v1303_v61 = vld [vmem:[#allocation7 + $0xd4] ss:$8 sps:$4 sm:$0xff]   ;;  %v1305_v62 = vld [vmem:[#allocation7 + $0xd0] ss:$8 sps:$4 sm:$0xff]   ;;  %v1306_v63 = vld [vmem:[#allocation7 + $0xe4] ss:$8 sps:$4 sm:$0xff]  }
  0x71   :  { %v1308_v0 = vld [vmem:[#allocation7 + $0xe0] ss:$8 sps:$4 sm:$0xff]   ;;  %v1309_v1 = vld [vmem:[#allocation7 + $0xf4] ss:$8 sps:$4 sm:$0xff]   ;;  %v1311_v2 = vld [vmem:[#allocation7 + $0xf0] ss:$8 sps:$4 sm:$0xff]  }
  0x72   :  { %332 = vmatpush1.bf16.msra.mxu0 %v1231_v11  ;;  %v1312_v3 = vld [vmem:[#allocation8] ss:$8 sps:$4 sm:$0xff]   ;;  %v1314_v4 = vld [vmem:[#allocation8 + $0x4] ss:$8 sps:$4 sm:$0xff]   ;;  %v1317_v5 = vld [vmem:[#allocation8 + $0x14] ss:$8 sps:$4 sm:$0xff]  }
  0x73   :  { %333 = vmatprep.subr.bf16.mxu0 %v1232_v12  ;;  %579 = vmatpush1.bf16.msra.mxu1 %v1278_v33  ;;  %v1315_v6 = vld [vmem:[#allocation8 + $0x10] ss:$8 sps:$4 sm:$0xff]   ;;  %v1320_v7 = vld [vmem:[#allocation8 + $0x24] ss:$8 sps:$4 sm:$0xff]   ;;  %v1318_v8 = vld [vmem:[#allocation8 + $0x20] ss:$8 sps:$4 sm:$0xff]  }
  0x74   :  { %580 = vmatprep.subr.bf16.mxu1 %v1279_v34  ;;  %v1323_v9 = vld [vmem:[#allocation8 + $0x34] ss:$8 sps:$4 sm:$0xff]   ;;  %v1321_v10 = vld [vmem:[#allocation8 + $0x30] ss:$8 sps:$4 sm:$0xff]   ;;  %v1326_v11 = vld [vmem:[#allocation8 + $0x44] ss:$8 sps:$4 sm:$0xff]  }
  0x75   :  { %v1324_v12 = vld [vmem:[#allocation8 + $0x40] ss:$8 sps:$4 sm:$0xff]   ;;  %v1327_v14 = vld [vmem:[#allocation8 + $0x50] ss:$8 sps:$4 sm:$0xff]   ;;  %v1332_v15 = vld [vmem:[#allocation8 + $0x64] ss:$8 sps:$4 sm:$0xff]  }
  0x76   :  { %334 = vmatpush1.bf16.msra.mxu0 %v1234_v13  ;;  %v1329_v13 = vld [vmem:[#allocation8 + $0x54] ss:$8 sps:$4 sm:$0xff]   ;;  %v1330_v16 = vld [vmem:[#allocation8 + $0x60] ss:$8 sps:$4 sm:$0xff]   ;;  %v1333_v18 = vld [vmem:[#allocation8 + $0x70] ss:$8 sps:$4 sm:$0xff]  }
  0x77   :  { %335 = vmatprep.subr.bf16.mxu0 %v1235_v19  ;;  %581 = vmatpush1.bf16.msra.mxu1 %v1281_v36  ;;  %v1335_v17 = vld [vmem:[#allocation8 + $0x74] ss:$8 sps:$4 sm:$0xff]   ;;  %v1338_v19 = vld [vmem:[#allocation8 + $0x84] ss:$8 sps:$4 sm:$0xff]   ;;  %v1339_v22 = vld [vmem:[#allocation8 + $0x90] ss:$8 sps:$4 sm:$0xff]  }
  0x78   :  { %582 = vmatprep.subr.bf16.mxu1 %v1282_v38  ;;  %v1341_v21 = vld [vmem:[#allocation8 + $0x94] ss:$8 sps:$4 sm:$0xff]   ;;  %v1345_v26 = vld [vmem:[#allocation8 + $0xb0] ss:$8 sps:$4 sm:$0xff]  }
  0x79   :  { %v1347_v25 = vld [vmem:[#allocation8 + $0xb4] ss:$8 sps:$4 sm:$0xff]   ;;  %v1351_v30 = vld [vmem:[#allocation8 + $0xd0] ss:$8 sps:$4 sm:$0xff]  }
  0x7a   :  { %336 = vmatpush1.bf16.msra.mxu0 %v1237_v20  ;;  %v1336_v20 = vld [vmem:[#allocation8 + $0x80] ss:$8 sps:$4 sm:$0xff]   ;;  %v1353_v29 = vld [vmem:[#allocation8 + $0xd4] ss:$8 sps:$4 sm:$0xff]   ;;  %v142_v34 = vld [vmem:[%s1821_s2] sm:$0x3] }
  0x7b   :  { %337 = vmatprep.subr.bf16.mxu0 %v1238_v23  ;;  %583 = vmatpush1.bf16.msra.mxu1 %v1284_v40  ;;  %v1344_v23 = vld [vmem:[#allocation8 + $0xa4] ss:$8 sps:$4 sm:$0xff]  }
  0x7c   :  { %584 = vmatprep.subr.bf16.mxu1 %v1285_v42 }
  0x7e   :  { %338 = vmatpush1.bf16.msra.mxu0 %v1240_v24  ;;  %v1342_v24 = vld [vmem:[#allocation8 + $0xa0] ss:$8 sps:$4 sm:$0xff]  }
  0x7f   :  { %339 = vmatprep.subr.bf16.mxu0 %v1241_v27  ;;  %585 = vmatpush1.bf16.msra.mxu1 %v1287_v44  ;;  %v1350_v27 = vld [vmem:[#allocation8 + $0xc4] ss:$8 sps:$4 sm:$0xff]  }
  0x80   :  { %586 = vmatprep.subr.bf16.mxu1 %v1288_v46 }
  0x82   :  { %340 = vmatpush1.bf16.msra.mxu0 %v1243_v28  ;;  %v1348_v28 = vld [vmem:[#allocation8 + $0xc0] ss:$8 sps:$4 sm:$0xff]  }
  0x83   :  { %341 = vmatprep.subr.bf16.mxu0 %v1244_v31  ;;  %587 = vmatpush1.bf16.msra.mxu1 %v1290_v48  ;;  %v144_v31 = vlaneseq  ;;  %v1356_v48 = vld [vmem:[#allocation8 + $0xe4] ss:$8 sps:$4 sm:$0xff]  }
  0x84   :  { %588 = vmatprep.subr.bf16.mxu1 %v1291_v50  ;;  %v1359_v50 = vld [vmem:[#allocation8 + $0xf4] ss:$8 sps:$4 sm:$0xff]  }
  0x86   :  { %342 = vmatpush1.bf16.msra.mxu0 %v1246_v32  ;;  %v145_v32 = vshrl.u32 %v144_v31, 7 }
  0x87   :  { %343 = vmatprep.subr.bf16.mxu0 %v1247_v35  ;;  %589 = vmatpush1.bf16.msra.mxu1 %v1293_v52  ;;  %v398_v52 = vld [vmem:[%s1823_s4] sm:$0x3] }
  0x88   :  { %590 = vmatprep.subr.bf16.mxu1 %v1294_v54  ;;  %v1746_v33 = vsub.s32 0, %v145_v32  ;;  %v1751_v35 = vsub.s32 1, %v145_v32 }
  0x8a   :  { %344 = vmatpush1.bf16.msra.mxu0 %v1249_v37  ;;  %v147_v36 = vrot.slane %v142_v34, %v1746_v33  ;;  %v151_v37 = vrot.slane %v142_v34, %v1751_v35  ;;  %v407_v54 = vrot.slane %v398_v52, %v1751_v35 }
  0x8b   :  { %345 = vmatprep.subr.bf16.mxu0 %v1250_v39  ;;  %591 = vmatpush1.bf16.msra.mxu1 %v1296_v56 }
  0x8c   :  { %592 = vmatprep.subr.bf16.mxu1 %v1297_v57 }
  0x8e   :  { %346 = vmatpush1.bf16.msra.mxu0 %v1252_v41 }
  0x8f   :  { %347 = vmatprep.subr.bf16.mxu0 %v1253_v43  ;;  %593 = vmatpush1.bf16.msra.mxu1 %v1299_v58 }
  0x90   :  { %594 = vmatprep.subr.bf16.mxu1 %v1300_v59 }
  0x92   :  { %348 = vmatpush1.bf16.msra.mxu0 %v1255_v45 }
  0x93   :  { %349 = vmatprep.subr.bf16.mxu0 %v1256_v47  ;;  %595 = vmatpush1.bf16.msra.mxu1 %v1302_v60 }
  0x94   :  { %596 = vmatprep.subr.bf16.mxu1 %v1303_v61 }
  0x96   :  { %350 = vmatpush1.bf16.msra.mxu0 %v1258_v49  ;;  %v1354_v49 = vld [vmem:[#allocation8 + $0xe0] ss:$8 sps:$4 sm:$0xff]  }
  0x97   :  { %351 = vmatprep.subr.bf16.mxu0 %v1259_v51  ;;  %597 = vmatpush1.bf16.msra.mxu1 %v1305_v62  ;;  %v1357_v51 = vld [vmem:[#allocation8 + $0xf0] ss:$8 sps:$4 sm:$0xff]  }
  0x98   :  { %598 = vmatprep.subr.bf16.mxu1 %v1306_v63 }
  0x9a   :  { %352 = vmatpush1.bf16.msra.mxu0 %v1261_v53  ;;  %v403_v53 = vrot.slane %v398_v52, %v1746_v33 }
  0x9b   :  { %599 = vmatpush1.bf16.msra.mxu1 %v1308_v0  ;;  %819 = vmatprep.subr.bf16.mxu0 %v1314_v4  ;;  %v1362_v4 = vld [vmem:[#allocation10 + $0x10] sm:$0xff]  }
  0x9c   :  { %600 = vmatprep.subr.bf16.mxu1 %v1309_v1  ;;  %v1360_v1 = vld [vmem:[#allocation10] sm:$0xff]  }
  0x9d   :  { %354 = vmatmul.mubr.bf16.vlgmr.msra.gmra.mrb[0].mxu0 %v1062_v55 }
  0x9e   :  { %820 = vmatpush1.bf16.msra.mxu0 %v1312_v3  ;;  %v1361_v3 = vld [vmem:[#allocation10 + $0x8] sm:$0xff]  }
  0x9f   :  { %601 = vmatpush1.bf16.msra.mxu1 %v1311_v2  ;;  %821 = vmatprep.subr.bf16.mxu0 %v1317_v5  ;;  %v1595_v2 = vmov 0.0   ;;  %v1363_v5 = vld [vmem:[#allocation10 + $0x18] sm:$0xff]  }
  0xa0   :  { %1179 = vmatprep.subr.bf16.mxu1 %v1595_v2 }
  0xa2   :  { %822 = vmatpush1.bf16.msra.mxu0 %v1315_v6  ;;  %v1364_v6 = vld [vmem:[#allocation10 + $0x20] sm:$0xff]  }
  0xa3   :  { %823 = vmatprep.subr.bf16.mxu0 %v1320_v7  ;;  %v1365_v7 = vld [vmem:[#allocation10 + $0x28] sm:$0xff]  }
  0xa6   :  { %824 = vmatpush1.bf16.msra.mxu0 %v1318_v8  ;;  %v1366_v8 = vld [vmem:[#allocation10 + $0x30] sm:$0xff]  }
  0xa7   :  { %825 = vmatprep.subr.bf16.mxu0 %v1323_v9  ;;  %v1367_v9 = vld [vmem:[#allocation10 + $0x38] sm:$0xff]  }
  0xaa   :  { %826 = vmatpush1.bf16.msra.mxu0 %v1321_v10  ;;  %v647_v10 = vld [vmem:[%s1825_s6] sm:$0x3] }
  0xab   :  { %827 = vmatprep.subr.bf16.mxu0 %v1326_v11  ;;  %v652_v11 = vrot.slane %v647_v10, %v1746_v33  ;;  %v876_v33 = vld [vmem:[%s1828_s9] sm:$0xff]  ;;  %s1597_s9 = smov [#allocation12]  }
  0xac   :  { %s1020_s0 = sshll.u32 %s1597_s9, 4  ;;  %s1021_s0 = int_to_ptr.vmem [resolvable:$true] %s1020_s0 }
  0xad   :  { %s1486_s25 = scalar_lea.vmem %s1021_s0, 128  ;;  %p1491_p13 = scmp.lt.s32.totalorder %s1021_s0, %s1021_s0 }
  0xae   :  { %828 = vmatpush1.bf16.msra.mxu0 %v1324_v12  ;;  %v656_v12 = vrot.slane %v647_v10, %v1751_v35  ;;  %p1487_p12 = scmp.ne.s32.totalorder %s1021_s0, %s1486_s25  ;;  %p1492_p0 = scmp.lt.s32.totalorder %s1486_s25, %s1486_s25 }
  0xaf   :  { %829 = vmatprep.subr.bf16.mxu0 %v1329_v13 }
  0xb0   :  { %p1493_p1 = por %p1492_p0, %p1491_p13 }
  0xb2   :  { %830 = vmatpush1.bf16.msra.mxu0 %v1327_v14  ;;  %p1494_p2 = pnand %p1493_p1, %p1487_p12 }
  0xb3   :  { %831 = vmatprep.subr.bf16.mxu0 %v1332_v15 }
  0xb6   :  { %832 = vmatpush1.bf16.msra.mxu0 %v1330_v16 }
  0xb7   :  { %833 = vmatprep.subr.bf16.mxu0 %v1335_v17 }
  0xba   :  { %834 = vmatpush1.bf16.msra.mxu0 %v1333_v18 }
  0xbb   :  { %835 = vmatprep.subr.bf16.mxu0 %v1338_v19 }
  0xbe   :  { %836 = vmatpush1.bf16.msra.mxu0 %v1336_v20 }
  0xbf   :  { %837 = vmatprep.subr.bf16.mxu0 %v1341_v21 }
  0xc2   :  { %838 = vmatpush1.bf16.msra.mxu0 %v1339_v22 }
  0xc3   :  { %839 = vmatprep.subr.bf16.mxu0 %v1344_v23 }
  0xc6   :  { %840 = vmatpush1.bf16.msra.mxu0 %v1342_v24 }
  0xc7   :  { %841 = vmatprep.subr.bf16.mxu0 %v1347_v25 }
  0xca   :  { %842 = vmatpush1.bf16.msra.mxu0 %v1345_v26 }
  0xcb   :  { %843 = vmatprep.subr.bf16.mxu0 %v1350_v27 }
  0xce   :  { %844 = vmatpush1.bf16.msra.mxu0 %v1348_v28 }
  0xcf   :  { %845 = vmatprep.subr.bf16.mxu0 %v1353_v29 }
  0xd2   :  { %846 = vmatpush1.bf16.msra.mxu0 %v1351_v30 }
  0xd3   :  { %847 = vmatprep.subr.bf16.mxu0 %v1356_v48 }
  0xd6   :  { %848 = vmatpush1.bf16.msra.mxu0 %v1354_v49 }
  0xd7   :  { %849 = vmatprep.subr.bf16.mxu0 %v1359_v50 }
  0xda   :  { %850 = vmatpush1.bf16.msra.mxu0 %v1357_v51 }
 0x170   :  { %v355_v38 = vpop.f32.mrb[0].mxu0 }
 0x171   :  { %v356_v39 = vadd.f32 %v355_v38, %v147_v36  ;;  %v357_v40 = vpop.f32.mrb[1].mxu0  ;;  %v1161_v38 = vld [vmem:[%s1827_s8] ss:$0 sm:$0xff] }
 0x172   :  { %v358_v41 = vadd.f32 %v357_v40, %v151_v37  ;;  %v359_v42 = vpop.f32.mrb[2].mxu0 }
 0x173   :  { %v362_v43 = vmax.f32 %v356_v39, 0.0  ;;  %v360_v44 = vpop.f32.mrb[3].mxu0 }
 0x174   :  { %v363_v45 = vmax.f32 %v358_v41, 0.0 }
 0x175   :  { %v364_v47 = vpack.c.bf16 %v362_v43, %v362_v43 }
 0x176   :  { %v365_v46 = vpack.c.bf16 %v363_v45, %v363_v45 }
 0x178   :  { %602 = vmatprep.mubr.bf16.mxu1 %v365_v46 }
 0x179   :  { %603 = vmatmul.mubr.bf16.vlgmr.msra.gmra.mrb[0].mxu1 %v364_v47 }
 0x17a   :  { %1180 = vmatpush3.bf16.msra.mxu1 %v1360_v1  ;;  %1195 = vmatprep.mubr.msk.bf16.mxu1 %vm1596_vm0, %v1595_v2 }
 0x17b   :  { %1181 = vmatprep.subr.bf16.mxu1 %v1595_v2 }
 0x17e   :  { %1182 = vmatpush3.bf16.msra.mxu1 %v1361_v3 }
 0x17f   :  { %1183 = vmatprep.subr.bf16.mxu1 %v1595_v2 }
 0x182   :  { %1184 = vmatpush3.bf16.msra.mxu1 %v1362_v4 }
 0x183   :  { %1185 = vmatprep.subr.bf16.mxu1 %v1595_v2 }
 0x186   :  { %1186 = vmatpush3.bf16.msra.mxu1 %v1363_v5 }
 0x187   :  { %1187 = vmatprep.subr.bf16.mxu1 %v1595_v2 }
 0x18a   :  { %1188 = vmatpush3.bf16.msra.mxu1 %v1364_v6 }
 0x18b   :  { %1189 = vmatprep.subr.bf16.mxu1 %v1595_v2 }
 0x18e   :  { %1190 = vmatpush3.bf16.msra.mxu1 %v1365_v7 }
 0x18f   :  { %1191 = vmatprep.subr.bf16.mxu1 %v1595_v2 }
 0x192   :  { %1192 = vmatpush3.bf16.msra.mxu1 %v1366_v8 }
 0x193   :  { %1193 = vmatprep.subr.bf16.mxu1 %v1595_v2 }
 0x196   :  { %1194 = vmatpush3.bf16.msra.mxu1 %v1367_v9 }
 0x24c   :  { %v604_v55 = vpop.f32.mrb[0].mxu1 }
 0x24d   :  { %v605_v56 = vadd.f32 %v604_v55, %v403_v53  ;;  %v606_v57 = vpop.f32.mrb[1].mxu1 }
 0x24e   :  { %v607_v58 = vadd.f32 %v606_v57, %v407_v54  ;;  %v608_v59 = vpop.f32.mrb[2].mxu1 }
 0x24f   :  { %v611_v60 = vmax.f32 %v605_v56, 0.0  ;;  %v609_v61 = vpop.f32.mrb[3].mxu1 }
 0x250   :  { %v612_v62 = vmax.f32 %v607_v58, 0.0 }
 0x251   :  { %v613_v0 = vpack.c.bf16 %v611_v60, %v611_v60 }
 0x252   :  { %v614_v63 = vpack.c.bf16 %v612_v62, %v612_v62 }
 0x254   :  { %851 = vmatprep.mubr.bf16.mxu0 %v614_v63 }
 0x255   :  { %852 = vmatmul.mubr.bf16.vlgmr.msra.gmra.mrb[4].mxu0 %v613_v0 }
 0x328   :  { %v853_v13 = vpop.f32.mrb[4].mxu0 }
 0x329   :  { %v854_v14 = vadd.f32 %v853_v13, %v652_v11  ;;  %v855_v15 = vpop.f32.mrb[5].mxu0 }
 0x32a   :  { %v856_v16 = vadd.f32 %v855_v15, %v656_v12  ;;  %v857_v17 = vpop.f32.mrb[6].mxu0 }
 0x32b   :  { %1002 = vst [vmem:[#allocation14] sm:$0xff] %v854_v14  ;;  %v858_v18 = vpop.f32.mrb[7].mxu0 }
 0x32c   :  { %v1160_v19 = vadd.f32 -5.0, %v856_v16 }
 0x32e   :  { %v862_v20 = vand.u32 2147483647, %v1160_v19  ;;  %v861_v31 = vmax.f32 %v1160_v19, 0.0 }
 0x330   :  { %v863_v21 = vsub.f32 0.0, %v862_v20 }
 0x332   :  { %v864_v22 = vmul.f32 1.442695, %v863_v21 }
 0x334   :  { %1368 = vpow2.f32 %v864_v22 }
 0x33e   :  { %v1369_v23 = vpop.eup %1368 }
 0x33f   :  { %v866_v24 = vadd.f32 1.0, %v1369_v23  ;;  %v869_v25 = vmul.f32 -0.5, %v1369_v23  ;;  %v872_v27 = vand.u32 2147483647, %v1369_v23 }
 0x341   :  { %1370 = vlog2.f32 %v866_v24  ;;  %v870_v26 = vadd.f32 1.0, %v869_v25  ;;  %vm873_vm1 = vcmp.lt.f32.partialorder %v872_v27, 0.0004427343 }
 0x343   :  { %v871_v30 = vmul.f32 %v1369_v23, %v870_v26 }
 0x34b   :  { %v1371_v28 = vpop.eup %1370 }
 0x34c   :  { %v868_v29 = vmul.f32 0.6931472, %v1371_v28 }
 0x34e   :  { %v874_v32 = vsel %vm873_vm1, %v871_v30, %v868_v29 }
 0x34f   :  { %v875_v34 = vadd.f32 %v874_v32, %v861_v31 }
 0x351   :  { %v877_v35 = vmul.f32 %v876_v33, %v875_v34  ;;  %1003 = vst [vmem:[#allocation15] sm:$0xff] %v875_v34 }
 0x353   :  { %v878_v36 = vadd.f32 %v877_v35, %v854_v14 }
 0x355   :  { %1001 = vst [vmem:[#allocation12] sm:$0xff] %v878_v36  ;;  %v879_v37 = vpack.c.bf16 %v878_v36, %v878_v36 }
 0x357   :  { %1196 = vmatmul.mubr.bf16.vlgmr.msra.gmra.mrb[4].mxu1 %v879_v37 }
 0x42a   :  { %v985_v39 = vpop.f32.mrb[4].mxu1 }
 0x42b   :  { %v986_v40 = vadd.f32 %v1161_v38, %v985_v39  ;;  %v1197_v41 = vpop.f32.mrb[5].mxu1 }
 0x42c   :  { %v988_v42 = vpop.f32.mrb[6].mxu1 }
 0x42d   :  { %991 = vmax.xlane.f32.xlu0 %v986_v40  ;;  %v1198_v43 = vpop.f32.mrb[7].mxu1 }
 0x4ba   :  { %v992_v44 = vpop.xlane.xlu0 %991 }
 0x4bb   :  { %v993_v45 = vsub.f32 %v986_v40, %v992_v44 }
 0x4bd   :  { %v994_v46 = vmul.f32 1.442695, %v993_v45 }
 0x4bf   :  { %1372 = vpow2.f32 %v994_v46 }
 0x4c9   :  { %v1373_v47 = vpop.eup %1372 }
 0x4ca   :  { %996 = vadd.xlane.f32.xlu0 %v1373_v47 }
 0x4cb   :  { %1497 = shalt.err (!%p1494_p2)
}
 0x4cc   :  { %s1498_s29 = scalar_lea.hbm %s1830_s11, 128 }
 0x4cd   :  { %p1499_p3 = scmp.ne.s32.totalorder %s1830_s11, %s1498_s29  ;;  %p1502_p4 = scmp.lt.u32.totalorder %s1498_s29, %s1830_s11 }
 0x4cf   :  { %p1504_p5 = pnand %p1502_p4, %p1499_p3 }
 0x4d1   :  { %1507 = shalt.err (!%p1504_p5)
}
 0x4d2   :  { %1023 = dma.vmem_to_hbm [thread:$0]  %s1021_s0, 128, %s1830_s11, [#allocation13]  }
 0x4d3   :  { %s1598_s17 = smov [#allocation14]  }
 0x4d4   :  { %s1030_s3 = sshll.u32 %s1598_s17, 4  ;;  %s1031_s3 = int_to_ptr.vmem [resolvable:$true] %s1030_s3 }
 0x4d5   :  { %s1508_s18 = scalar_lea.vmem %s1031_s3, 128  ;;  %p1513_p7 = scmp.lt.s32.totalorder %s1031_s3, %s1031_s3 }
 0x4d6   :  { %p1509_p6 = scmp.ne.s32.totalorder %s1031_s3, %s1508_s18  ;;  %p1514_p8 = scmp.lt.s32.totalorder %s1508_s18, %s1508_s18 }
 0x4d8   :  { %p1515_p9 = por %p1514_p8, %p1513_p7 }
 0x4da   :  { %p1516_p10 = pnand %p1515_p9, %p1509_p6 }
 0x4dc   :  { %1519 = shalt.err (!%p1516_p10)
}
 0x4dd   :  { %s1520_s7 = scalar_lea.hbm %s1831_s12, 128 }
 0x4de   :  { %p1521_p11 = scmp.ne.s32.totalorder %s1831_s12, %s1520_s7  ;;  %p1524_p12 = scmp.lt.u32.totalorder %s1520_s7, %s1831_s12 }
 0x4e0   :  { %p1526_p13 = pnand %p1524_p12, %p1521_p11 }
 0x4e2   :  { %1529 = shalt.err (!%p1526_p13)
}
 0x4e3   :  { %1033 = dma.vmem_to_hbm [thread:$0]  %s1031_s3, 128, %s1831_s12, [#allocation13]  }
 0x4e4   :  { %s1599_s6 = smov [#allocation15]  }
 0x4e5   :  { %s1040_s22 = sshll.u32 %s1599_s6, 4  ;;  %s1041_s22 = int_to_ptr.vmem [resolvable:$true] %s1040_s22 }
 0x4e6   :  { %s1530_s24 = scalar_lea.vmem %s1041_s22, 128  ;;  %p1535_p1 = scmp.lt.s32.totalorder %s1041_s22, %s1041_s22 }
 0x4e7   :  { %p1531_p0 = scmp.ne.s32.totalorder %s1041_s22, %s1530_s24  ;;  %p1536_p2 = scmp.lt.s32.totalorder %s1530_s24, %s1530_s24 }
 0x4e9   :  { %p1537_p3 = por %p1536_p2, %p1535_p1 }
 0x4eb   :  { %p1538_p4 = pnand %p1537_p3, %p1531_p0 }
 0x4ed   :  { %1541 = shalt.err (!%p1538_p4)
}
 0x4ee   :  { %s1542_s0 = scalar_lea.hbm %s1832_s13, 128 }
 0x4ef   :  { %p1543_p5 = scmp.ne.s32.totalorder %s1832_s13, %s1542_s0  ;;  %p1546_p6 = scmp.lt.u32.totalorder %s1542_s0, %s1832_s13 }
 0x4f1   :  { %p1548_p7 = pnand %p1546_p6, %p1543_p5 }
 0x4f3   :  { %1551 = shalt.err (!%p1548_p7)
}
 0x4f4   :  { %1043 = dma.vmem_to_hbm [thread:$0]  %s1041_s22, 128, %s1832_s13, [#allocation16]  }
 0x4f5   :  { %s1600_s5 = smov [#allocation11]  }
 0x4f6   :  { %s1010_s23 = sshll.u32 %s1600_s5, 4  ;;  %s1011_s23 = int_to_ptr.vmem [resolvable:$true] %s1010_s23 }
 0x4f7   :  { %s1552_s14 = scalar_lea.vmem %s1011_s23, 128  ;;  %p1557_p9 = scmp.lt.s32.totalorder %s1011_s23, %s1011_s23 }
 0x4f8   :  { %p1553_p8 = scmp.ne.s32.totalorder %s1011_s23, %s1552_s14  ;;  %p1558_p10 = scmp.lt.s32.totalorder %s1552_s14, %s1552_s14 }
 0x4fa   :  { %p1559_p11 = por %p1558_p10, %p1557_p9 }
 0x4fc   :  { %p1560_p12 = pnand %p1559_p11, %p1553_p8 }
 0x557   :  { %v997_v48 = vpop.xlane.xlu0 %996 }
 0x558   :  { %1374 = vrcp.f32 %v997_v48 }
 0x562   :  { %v1375_v49 = vpop.eup %1374 }
 0x563   :  { %v999_v50 = vmul.f32 %v1375_v49, %v1373_v47 }
 0x565   :  { %1000 = vst [vmem:[#allocation11] sm:$0xff] %v999_v50 }
 0x566   :  { %1563 = shalt.err (!%p1560_p12)
}
 0x567   :  { %s1564_s17 = scalar_lea.hbm %s1829_s10, 128 }
 0x568   :  { %p1565_p13 = scmp.ne.s32.totalorder %s1829_s10, %s1564_s17  ;;  %p1568_p0 = scmp.lt.u32.totalorder %s1564_s17, %s1829_s10 }
 0x56a   :  { %p1570_p1 = pnand %p1568_p0, %p1565_p13 }
 0x56c   :  { %1573 = shalt.err (!%p1570_p1)
}
 0x56d   :  { %1013 = dma.vmem_to_hbm [thread:$0]  %s1011_s23, 128, %s1829_s10, [#allocation4]  }
 0x56e   :  { %1580 = dma.done.wait [#allocation4], 128  }
 0x56f   :  { %1581 = vsyncadd [#allocation4], 4294967168 }
 0x570   :  { %1582 = dma.done.wait [#allocation13], 256  }
 0x571   :  { %1583 = vsyncadd [#allocation13], 4294967040 }
 0x572   :  { %1584 = dma.done.wait [#allocation16], 128  }
 0x573   :  { %1585 = vsyncadd [#allocation16], 4294967168 }
 0x574   :  { %1056 = vsyncpa [#allocation3], 1 }
 0x575   :  { %1057 = vsyncpa [#allocation6], 1 }
 0x576   :  { %1058 = vsyncpa [#allocation9], 1 }
 0x577   :  { %1059 = vsyncpa [#allocation4], 1 }
 0x578   :  { %1060 = vsyncpa [#allocation13], 1 }
 0x579   :  { %1061 = vsyncpa [#allocation16], 1 }

</bundles_post_ra>
